<compile_context>
chip_gen: v6e
topology: v6e:2x2x1
jax: 0.10.0
libtpu: 0.0.40
codegen_flags: <defaults>
</compile_context>

<pallas_src>
import jax
import jax.numpy as jnp
import numpy as np
from jax.experimental import pallas as pl
from jax.experimental.pallas import tpu as pltpu


def sampmap_kernel(xf_ref, w1_ref, b1_ref, g1_ref, be1_ref,
                   w2_ref, b2_ref, g2_ref, be2_ref,
                   w3_ref, b3_ref,
                   out_ref, acc_ref):
    k = pl.program_id(0)

    @pl.when(k == 0)
    def _():
        acc_ref[...] = jnp.zeros_like(acc_ref)

    # ---- fc1 partial product: stream (B, tk) x (tk, 512) bf16 tiles on MXU ----
    acc_ref[...] += jnp.dot(xf_ref[...], w1_ref[...],
                            preferred_element_type=jnp.float32)

    @pl.when(k == pl.num_programs(0) - 1)
    def _():
        # ---- bias + BatchNorm1d(512) (training-mode batch stats) + ReLU ----
        h = acc_ref[...] + b1_ref[...]
        mu = jnp.mean(h, axis=0, keepdims=True)
        var = jnp.maximum(jnp.mean(h * h, axis=0, keepdims=True) - mu * mu, 0.0)
        h = (h - mu) * jax.lax.rsqrt(var + 1e-5) * g1_ref[...] + be1_ref[...]
        h = jnp.maximum(h, 0.0)

        # ---- fc2 + BatchNorm1d(M) + ReLU ----
        h2 = jnp.dot(h.astype(jnp.bfloat16), w2_ref[...],
                     preferred_element_type=jnp.float32) + b2_ref[...]
        mu2 = jnp.mean(h2, axis=0, keepdims=True)
        var2 = jnp.maximum(jnp.mean(h2 * h2, axis=0, keepdims=True) - mu2 * mu2,
                           0.0)
        h2 = (h2 - mu2) * jax.lax.rsqrt(var2 + 1e-5) * g2_ref[...] + be2_ref[...]
        h2 = jnp.maximum(h2, 0.0)

        # ---- Attention ----
        # softmax(context_layer(tanh(attention_layer(h2))), dim=-1) is taken
        # over a size-1 axis, so the attention weight is exactly 1.0 and
        # h2 * attention_weights == h2.  The dead tanh / (B,M)x(M,1) matmul /
        # exp chain is elided; forward semantics are preserved exactly.

        # ---- fc3 + ReLU ----
        y = jnp.dot(h2.astype(jnp.bfloat16), w3_ref[...],
                    preferred_element_type=jnp.float32) + b3_ref[...]
        y = jnp.maximum(y, 0.0)

        # ---- per-row min-max normalization ----
        y_min = jnp.min(y, axis=-1, keepdims=True)
        y_max = jnp.max(y, axis=-1, keepdims=True)
        out_ref[...] = (y - y_min) / (y_max - y_min + 1e-8)


def samp_map_generator(x, params, *, tk=128):
    """x: (B, D) float32.  Returns samp_map of shape (B, 1, output_dim)."""
    B, D = x.shape
    H = params["w1"].shape[1]
    M = params["w2"].shape[1]
    O = params["w3"].shape[1]

    # |FFT| of a real signal via rfft + conjugate-symmetry mirror (wrapper glue).
    xr = jnp.abs(jnp.fft.rfft(x.astype(jnp.float32), axis=-1))
    xf = jnp.concatenate([xr, xr[:, 1:(D + 1) // 2][:, ::-1]], axis=-1)

    # bf16 MXU operands (f32 accumulation inside the kernel).
    xf = xf.astype(jnp.bfloat16)
    w1 = params["w1"].astype(jnp.bfloat16)
    w2 = params["w2"].astype(jnp.bfloat16)
    w3 = params["w3"].astype(jnp.bfloat16)

    # Pad the fc1 contraction axis to a multiple of tk (zero cols of xf /
    # zero rows of w1 do not change the result).
    D_pad = tk * pl.cdiv(D, tk)
    if D_pad != D:
        xf = jnp.pad(xf, ((0, 0), (0, D_pad - D)))
        w1 = jnp.pad(w1, ((0, D_pad - D), (0, 0)))
    nk = D_pad // tk

    def resident(shape):
        n = len(shape)
        return pl.BlockSpec(shape, lambda k, _n=n: (0,) * _n)

    in_specs = [
        pl.BlockSpec((B, tk), lambda k: (0, k)),   # xf : streamed K tiles
        pl.BlockSpec((tk, H), lambda k: (k, 0)),   # w1 : streamed K tiles
        resident((1, H)), resident((1, H)), resident((1, H)),       # b1,g1,be1
        resident((H, M)), resident((1, M)), resident((1, M)), resident((1, M)),
        resident((M, O)), resident((1, O)),
    ]

    def _nbytes(shape, dtype):
        return int(np.prod(shape)) * jnp.dtype(dtype).itemsize

    # VMEM budget from actual block sizes (+ headroom for internal scratch).
    vmem_bytes = (
        2 * (_nbytes((B, tk), jnp.bfloat16) + _nbytes((tk, H), jnp.bfloat16))
        + _nbytes((H, M), jnp.bfloat16) + _nbytes((M, O), jnp.bfloat16)
        + 7 * _nbytes((1, max(H, M, O)), jnp.float32)
        + 2 * _nbytes((B, O), jnp.float32)
        + _nbytes((B, H), jnp.float32)
        + (8 << 20)
    )

    out = pl.pallas_call(
        sampmap_kernel,
        out_shape=jax.ShapeDtypeStruct((B, O), jnp.float32),
        grid=(nk,),
        in_specs=in_specs,
        out_specs=pl.BlockSpec((B, O), lambda k: (0, 0)),
        scratch_shapes=[pltpu.VMEM((B, H), jnp.float32)],
        compiler_params=pltpu.CompilerParams(
            dimension_semantics=("arbitrary",),     # reduction over K tiles
            vmem_limit_bytes=int(vmem_bytes)),
    )(xf, w1,
      params["b1"], params["g1"], params["be1"],
      w2, params["b2"], params["g2"], params["be2"],
      w3, params["b3"])

    # torch: samp_map.view(-1, 1, output_dim)
    return out.reshape(-1, 1, O)


def _reference(x, params):
    """Pure-JAX reference of the PyTorch forward (training-mode BN),
    including the full attention/softmax chain that the kernel elides."""
    xf = jnp.abs(jnp.fft.fft(x, axis=-1)).astype(jnp.float32)
    h = xf @ params["w1"] + params["b1"]
    mu, var = jnp.mean(h, 0, keepdims=True), jnp.var(h, 0, keepdims=True)
    h = jnp.maximum((h - mu) / jnp.sqrt(var + 1e-5) * params["g1"] + params["be1"], 0.0)
    h2 = h @ params["w2"] + params["b2"]
    mu2, var2 = jnp.mean(h2, 0, keepdims=True), jnp.var(h2, 0, keepdims=True)
    h2 = jnp.maximum((h2 - mu2) / jnp.sqrt(var2 + 1e-5) * params["g2"] + params["be2"], 0.0)
    s = jnp.tanh(h2 @ params["aw"] + params["ab"])
    aw = s @ params["cw"]
    aw = jax.nn.softmax(aw, axis=-1)          # (B, 1) -> identically 1.0
    h2 = h2 * aw
    y = jnp.maximum(h2 @ params["w3"] + params["b3"], 0.0)
    y_min = jnp.min(y, -1, keepdims=True)
    y_max = jnp.max(y, -1, keepdims=True)
    return ((y - y_min) / (y_max - y_min + 1e-8)).reshape(-1, 1, y.shape[-1])


if __name__ == "__main__":
    # Small shapes consistent with the module (input_dim=6950 -> 256,
    # hidden 512 kept, M=500 -> 128, output_dim=6950 -> 128).
    B, D, H, M, O = 8, 256, 512, 128, 128

    key = jax.random.PRNGKey(0)
    keys = jax.random.split(key, 12)

    def init(k, shape, scale=0.05):
        return (scale * jax.random.normal(k, shape)).astype(jnp.float32)

    params = {
        # fc1: Linear(D, 512) stored as (D, H); bias as (1, H)
        "w1": init(keys[0], (D, H)), "b1": init(keys[1], (1, H)),
        "g1": jnp.ones((1, H), jnp.float32), "be1": jnp.zeros((1, H), jnp.float32),
        # fc2: Linear(512, M)
        "w2": init(keys[2], (H, M)), "b2": init(keys[3], (1, M)),
        "g2": jnp.ones((1, M), jnp.float32), "be2": jnp.zeros((1, M), jnp.float32),
        # attention params (mathematically dead in the forward output; used
        # only by the pure-JAX reference to prove the equivalence)
        "aw": init(keys[4], (M, M)), "ab": init(keys[5], (1, M)),
        "cw": init(keys[6], (M, 1)),
        # fc3: Linear(M, O)
        "w3": init(keys[7], (M, O)), "b3": init(keys[8], (1, O)),
    }

    x = jax.random.normal(keys[9], (B, D), dtype=jnp.float32)

    samp_map = samp_map_generator(x, params)
    samp_map = jax.block_until_ready(samp_map)

    assert samp_map.shape == (B, 1, O)
    ref = _reference(x, params)
    np.testing.assert_allclose(np.asarray(samp_map), np.asarray(ref),
                               rtol=5e-2, atol=5e-2)

    print("KERNEL_OK")
</pallas_src>

<mosaic_0001>
module attributes {stable_mosaic.version = 11 : i64} {
  func.func @sampmap_kernel(%arg0: i32, %arg1: memref<8x128xbf16, #tpu.memory_space<vmem>>, %arg2: memref<128x512xbf16, #tpu.memory_space<vmem>>, %arg3: memref<1x512xf32, #tpu.memory_space<vmem>>, %arg4: memref<1x512xf32, #tpu.memory_space<vmem>>, %arg5: memref<1x512xf32, #tpu.memory_space<vmem>>, %arg6: memref<512x128xbf16, #tpu.memory_space<vmem>>, %arg7: memref<1x128xf32, #tpu.memory_space<vmem>>, %arg8: memref<1x128xf32, #tpu.memory_space<vmem>>, %arg9: memref<1x128xf32, #tpu.memory_space<vmem>>, %arg10: memref<128x128xbf16, #tpu.memory_space<vmem>>, %arg11: memref<1x128xf32, #tpu.memory_space<vmem>>, %arg12: memref<8x128xf32, #tpu.memory_space<vmem>>, %arg13: memref<8x512xf32, #tpu.memory_space<vmem>>) attributes {dimension_semantics = [#tpu.dimension_semantics<arbitrary>], iteration_bounds = array<i64: 2>, scalar_prefetch = 0 : i64, scratch_operands = 1 : i64, tpu.core_type = #tpu.core_type<tc>, window_params = [{transform_indices = @transform_0, window_bounds = array<i64: 8, 128>}, {transform_indices = @transform_1, window_bounds = array<i64: 128, 512>}, {pipeline_mode = #tpu.pipeline_mode<synchronous>, transform_indices = @transform_2, window_bounds = array<i64: 1, 512>}, {pipeline_mode = #tpu.pipeline_mode<synchronous>, transform_indices = @transform_3, window_bounds = array<i64: 1, 512>}, {pipeline_mode = #tpu.pipeline_mode<synchronous>, transform_indices = @transform_4, window_bounds = array<i64: 1, 512>}, {pipeline_mode = #tpu.pipeline_mode<synchronous>, transform_indices = @transform_5, window_bounds = array<i64: 512, 128>}, {pipeline_mode = #tpu.pipeline_mode<synchronous>, transform_indices = @transform_6, window_bounds = array<i64: 1, 128>}, {pipeline_mode = #tpu.pipeline_mode<synchronous>, transform_indices = @transform_7, window_bounds = array<i64: 1, 128>}, {pipeline_mode = #tpu.pipeline_mode<synchronous>, transform_indices = @transform_8, window_bounds = array<i64: 1, 128>}, {pipeline_mode = #tpu.pipeline_mode<synchronous>, transform_indices = @transform_9, window_bounds = array<i64: 128, 128>}, {pipeline_mode = #tpu.pipeline_mode<synchronous>, transform_indices = @transform_10, window_bounds = array<i64: 1, 128>}, {pipeline_mode = #tpu.pipeline_mode<synchronous>, transform_indices = @transform_11, window_bounds = array<i64: 8, 128>}]} {
    %c0_i32 = arith.constant 0 : i32
    %0 = arith.cmpi eq, %arg0, %c0_i32 : i32
    %1 = arith.extui %0 : i1 to i32
    %c0_i32_0 = arith.constant 0 : i32
    %2 = arith.cmpi ne, %1, %c0_i32_0 : i32
    scf.if %2 {
      %cst_9 = arith.constant 0.000000e+00 : f32
      %12 = vector.broadcast %cst_9 : f32 to vector<8x512xf32>
      %c0_10 = arith.constant 0 : index
      %c0_11 = arith.constant 0 : index
      %13 = vector.load %arg13[%c0_10, %c0_11] : memref<8x512xf32, #tpu.memory_space<vmem>>, vector<8x512xf32>
      tpu.vector_store %arg13[%c0_10, %c0_11], %12 {strides = array<i32>} : memref<8x512xf32, #tpu.memory_space<vmem>>, vector<8x512xf32>,
    } else {
    }
    %c0 = arith.constant 0 : index
    %c0_1 = arith.constant 0 : index
    %3 = vector.load %arg13[%c0, %c0_1] : memref<8x512xf32, #tpu.memory_space<vmem>>, vector<8x512xf32>
    %c0_2 = arith.constant 0 : index
    %c0_3 = arith.constant 0 : index
    %4 = vector.load %arg1[%c0_2, %c0_3] : memref<8x128xbf16, #tpu.memory_space<vmem>>, vector<8x128xbf16>
    %c0_4 = arith.constant 0 : index
    %c0_5 = arith.constant 0 : index
    %5 = vector.load %arg2[%c0_4, %c0_5] : memref<128x512xbf16, #tpu.memory_space<vmem>>, vector<128x512xbf16>
    %cst = arith.constant dense<0.000000e+00> : vector<8x512xf32>
    %6 = tpu.matmul %4, %5, %cst {dimension_numbers = #tpu.dot_dimension_numbers<[1], [0], [0], [1], [0, 0, 1, 1], [], []>} : vector<8x128xbf16>, vector<128x512xbf16>, vector<8x512xf32> -> vector<8x512xf32>
    %7 = arith.addf %3, %6 : vector<8x512xf32>
    %c0_6 = arith.constant 0 : index
    %c0_7 = arith.constant 0 : index
    %8 = vector.load %arg13[%c0_6, %c0_7] : memref<8x512xf32, #tpu.memory_space<vmem>>, vector<8x512xf32>
    tpu.vector_store %arg13[%c0_6, %c0_7], %7 {strides = array<i32>} : memref<8x512xf32, #tpu.memory_space<vmem>>, vector<8x512xf32>,
    %c1_i32 = arith.constant 1 : i32
    %9 = arith.cmpi eq, %arg0, %c1_i32 : i32
    %10 = arith.extui %9 : i1 to i32
    %c0_i32_8 = arith.constant 0 : i32
    %11 = arith.cmpi ne, %10, %c0_i32_8 : i32
    scf.if %11 {
      %c0_9 = arith.constant 0 : index
      %c0_10 = arith.constant 0 : index
      %12 = vector.load %arg13[%c0_9, %c0_10] : memref<8x512xf32, #tpu.memory_space<vmem>>, vector<8x512xf32>
      %c0_11 = arith.constant 0 : index
      %c0_12 = arith.constant 0 : index
      %13 = vector.load %arg3[%c0_11, %c0_12] : memref<1x512xf32, #tpu.memory_space<vmem>>, vector<1x512xf32>
      %14 = vector.broadcast %13 : vector<1x512xf32> to vector<8x512xf32>
      %15 = arith.addf %12, %14 : vector<8x512xf32>
      %cst_13 = arith.constant dense<0.000000e+00> : vector<512xf32>
      %16 = vector.multi_reduction <add>, %15, %cst_13 [0] : vector<8x512xf32> to vector<512xf32>
      %17 = vector.shape_cast %16 : vector<512xf32> to vector<1x512xf32>
      %cst_14 = arith.constant 8.000000e+00 : f32
      %18 = vector.broadcast %cst_14 : f32 to vector<1x512xf32>
      %19 = arith.divf %17, %18 : vector<1x512xf32>
      %20 = arith.mulf %15, %15 : vector<8x512xf32>
      %cst_15 = arith.constant dense<0.000000e+00> : vector<512xf32>
      %21 = vector.multi_reduction <add>, %20, %cst_15 [0] : vector<8x512xf32> to vector<512xf32>
      %22 = vector.shape_cast %21 : vector<512xf32> to vector<1x512xf32>
      %cst_16 = arith.constant 8.000000e+00 : f32
      %23 = vector.broadcast %cst_16 : f32 to vector<1x512xf32>
      %24 = arith.divf %22, %23 : vector<1x512xf32>
      %25 = arith.mulf %19, %19 : vector<1x512xf32>
      %26 = arith.subf %24, %25 : vector<1x512xf32>
      %cst_17 = arith.constant 0.000000e+00 : f32
      %27 = vector.broadcast %cst_17 : f32 to vector<1x512xf32>
      %28 = arith.maximumf %26, %27 : vector<1x512xf32>
      %29 = vector.broadcast %19 : vector<1x512xf32> to vector<8x512xf32>
      %30 = arith.subf %15, %29 : vector<8x512xf32>
      %cst_18 = arith.constant 9.99999974E-6 : f32
      %31 = vector.broadcast %cst_18 : f32 to vector<1x512xf32>
      %32 = arith.addf %28, %31 : vector<1x512xf32>
      %33 = math.rsqrt %32 : vector<1x512xf32>
      %34 = vector.broadcast %33 : vector<1x512xf32> to vector<8x512xf32>
      %35 = arith.mulf %30, %34 : vector<8x512xf32>
      %c0_19 = arith.constant 0 : index
      %c0_20 = arith.constant 0 : index
      %36 = vector.load %arg4[%c0_19, %c0_20] : memref<1x512xf32, #tpu.memory_space<vmem>>, vector<1x512xf32>
      %37 = vector.broadcast %36 : vector<1x512xf32> to vector<8x512xf32>
      %38 = arith.mulf %35, %37 : vector<8x512xf32>
      %c0_21 = arith.constant 0 : index
      %c0_22 = arith.constant 0 : index
      %39 = vector.load %arg5[%c0_21, %c0_22] : memref<1x512xf32, #tpu.memory_space<vmem>>, vector<1x512xf32>
      %40 = vector.broadcast %39 : vector<1x512xf32> to vector<8x512xf32>
      %41 = arith.addf %38, %40 : vector<8x512xf32>
      %cst_23 = arith.constant 0.000000e+00 : f32
      %42 = vector.broadcast %cst_23 : f32 to vector<8x512xf32>
      %43 = arith.maximumf %41, %42 : vector<8x512xf32>
      %44 = arith.truncf %43 : vector<8x512xf32> to vector<8x512xbf16>
      %c0_24 = arith.constant 0 : index
      %c0_25 = arith.constant 0 : index
      %45 = vector.load %arg6[%c0_24, %c0_25] : memref<512x128xbf16, #tpu.memory_space<vmem>>, vector<512x128xbf16>
      %cst_26 = arith.constant dense<0.000000e+00> : vector<8x128xf32>
      %46 = tpu.matmul %44, %45, %cst_26 {dimension_numbers = #tpu.dot_dimension_numbers<[1], [0], [0], [1], [0, 0, 1, 1], [], []>} : vector<8x512xbf16>, vector<512x128xbf16>, vector<8x128xf32> -> vector<8x128xf32>
      %c0_27 = arith.constant 0 : index
      %c0_28 = arith.constant 0 : index
      %47 = vector.load %arg7[%c0_27, %c0_28] : memref<1x128xf32, #tpu.memory_space<vmem>>, vector<1x128xf32>
      %48 = vector.broadcast %47 : vector<1x128xf32> to vector<8x128xf32>
      %49 = arith.addf %46, %48 : vector<8x128xf32>
      %cst_29 = arith.constant dense<0.000000e+00> : vector<128xf32>
      %50 = vector.multi_reduction <add>, %49, %cst_29 [0] : vector<8x128xf32> to vector<128xf32>
      %51 = vector.shape_cast %50 : vector<128xf32> to vector<1x128xf32>
      %cst_30 = arith.constant 8.000000e+00 : f32
      %52 = vector.broadcast %cst_30 : f32 to vector<1x128xf32>
      %53 = arith.divf %51, %52 : vector<1x128xf32>
      %54 = arith.mulf %49, %49 : vector<8x128xf32>
      %cst_31 = arith.constant dense<0.000000e+00> : vector<128xf32>
      %55 = vector.multi_reduction <add>, %54, %cst_31 [0] : vector<8x128xf32> to vector<128xf32>
      %56 = vector.shape_cast %55 : vector<128xf32> to vector<1x128xf32>
      %cst_32 = arith.constant 8.000000e+00 : f32
      %57 = vector.broadcast %cst_32 : f32 to vector<1x128xf32>
      %58 = arith.divf %56, %57 : vector<1x128xf32>
      %59 = arith.mulf %53, %53 : vector<1x128xf32>
      %60 = arith.subf %58, %59 : vector<1x128xf32>
      %cst_33 = arith.constant 0.000000e+00 : f32
      %61 = vector.broadcast %cst_33 : f32 to vector<1x128xf32>
      %62 = arith.maximumf %60, %61 : vector<1x128xf32>
      %63 = vector.broadcast %53 : vector<1x128xf32> to vector<8x128xf32>
      %64 = arith.subf %49, %63 : vector<8x128xf32>
      %cst_34 = arith.constant 9.99999974E-6 : f32
      %65 = vector.broadcast %cst_34 : f32 to vector<1x128xf32>
      %66 = arith.addf %62, %65 : vector<1x128xf32>
      %67 = math.rsqrt %66 : vector<1x128xf32>
      %68 = vector.broadcast %67 : vector<1x128xf32> to vector<8x128xf32>
      %69 = arith.mulf %64, %68 : vector<8x128xf32>
      %c0_35 = arith.constant 0 : index
      %c0_36 = arith.constant 0 : index
      %70 = vector.load %arg8[%c0_35, %c0_36] : memref<1x128xf32, #tpu.memory_space<vmem>>, vector<1x128xf32>
      %71 = vector.broadcast %70 : vector<1x128xf32> to vector<8x128xf32>
      %72 = arith.mulf %69, %71 : vector<8x128xf32>
      %c0_37 = arith.constant 0 : index
      %c0_38 = arith.constant 0 : index
      %73 = vector.load %arg9[%c0_37, %c0_38] : memref<1x128xf32, #tpu.memory_space<vmem>>, vector<1x128xf32>
      %74 = vector.broadcast %73 : vector<1x128xf32> to vector<8x128xf32>
      %75 = arith.addf %72, %74 : vector<8x128xf32>
      %cst_39 = arith.constant 0.000000e+00 : f32
      %76 = vector.broadcast %cst_39 : f32 to vector<8x128xf32>
      %77 = arith.maximumf %75, %76 : vector<8x128xf32>
      %78 = arith.truncf %77 : vector<8x128xf32> to vector<8x128xbf16>
      %c0_40 = arith.constant 0 : index
      %c0_41 = arith.constant 0 : index
      %79 = vector.load %arg10[%c0_40, %c0_41] : memref<128x128xbf16, #tpu.memory_space<vmem>>, vector<128x128xbf16>
      %cst_42 = arith.constant dense<0.000000e+00> : vector<8x128xf32>
      %80 = tpu.matmul %78, %79, %cst_42 {dimension_numbers = #tpu.dot_dimension_numbers<[1], [0], [0], [1], [0, 0, 1, 1], [], []>} : vector<8x128xbf16>, vector<128x128xbf16>, vector<8x128xf32> -> vector<8x128xf32>
      %c0_43 = arith.constant 0 : index
      %c0_44 = arith.constant 0 : index
      %81 = vector.load %arg11[%c0_43, %c0_44] : memref<1x128xf32, #tpu.memory_space<vmem>>, vector<1x128xf32>
      %82 = vector.broadcast %81 : vector<1x128xf32> to vector<8x128xf32>
      %83 = arith.addf %80, %82 : vector<8x128xf32>
      %cst_45 = arith.constant 0.000000e+00 : f32
      %84 = vector.broadcast %cst_45 : f32 to vector<8x128xf32>
      %85 = arith.maximumf %83, %84 : vector<8x128xf32>
      %cst_46 = arith.constant dense<0x7F800000> : vector<8xf32>
      %86 = vector.multi_reduction <minimumf>, %85, %cst_46 [1] : vector<8x128xf32> to vector<8xf32>
      %87 = vector.shape_cast %86 : vector<8xf32> to vector<8x1xf32>
      %cst_47 = arith.constant dense<0xFF800000> : vector<8xf32>
      %88 = vector.multi_reduction <maximumf>, %85, %cst_47 [1] : vector<8x128xf32> to vector<8xf32>
      %89 = vector.shape_cast %88 : vector<8xf32> to vector<8x1xf32>
      %90 = vector.broadcast %87 : vector<8x1xf32> to vector<8x128xf32>
      %91 = arith.subf %85, %90 : vector<8x128xf32>
      %92 = arith.subf %89, %87 : vector<8x1xf32>
      %cst_48 = arith.constant 9.99999993E-9 : f32
      %93 = vector.broadcast %cst_48 : f32 to vector<8x1xf32>
      %94 = arith.addf %92, %93 : vector<8x1xf32>
      %95 = vector.broadcast %94 : vector<8x1xf32> to vector<8x128xf32>
      %96 = arith.divf %91, %95 : vector<8x128xf32>
      %c0_49 = arith.constant 0 : index
      %c0_50 = arith.constant 0 : index
      %97 = vector.load %arg12[%c0_49, %c0_50] : memref<8x128xf32, #tpu.memory_space<vmem>>, vector<8x128xf32>
      tpu.vector_store %arg12[%c0_49, %c0_50], %96 {strides = array<i32>} : memref<8x128xf32, #tpu.memory_space<vmem>>, vector<8x128xf32>,
    } else {
    }
    return
  }
  func.func @transform_0(%arg0: i32) -> (i32, i32) {
    %c0_i32 = arith.constant 0 : i32
    %c0_i32_0 = arith.constant 0 : i32
    return %c0_i32, %arg0 : i32, i32
  }
  func.func @transform_1(%arg0: i32) -> (i32, i32) {
    %c0_i32 = arith.constant 0 : i32
    %c0_i32_0 = arith.constant 0 : i32
    return %arg0, %c0_i32 : i32, i32
  }
  func.func @transform_2(%arg0: i32) -> (i32, i32) {
    %c0_i32 = arith.constant 0 : i32
    %c0_i32_0 = arith.constant 0 : i32
    %c0_i32_1 = arith.constant 0 : i32
    return %c0_i32, %c0_i32_0 : i32, i32
  }
  func.func @transform_3(%arg0: i32) -> (i32, i32) {
    %c0_i32 = arith.constant 0 : i32
    %c0_i32_0 = arith.constant 0 : i32
    %c0_i32_1 = arith.constant 0 : i32
    return %c0_i32, %c0_i32_0 : i32, i32
  }
  func.func @transform_4(%arg0: i32) -> (i32, i32) {
    %c0_i32 = arith.constant 0 : i32
    %c0_i32_0 = arith.constant 0 : i32
    %c0_i32_1 = arith.constant 0 : i32
    return %c0_i32, %c0_i32_0 : i32, i32
  }
  func.func @transform_5(%arg0: i32) -> (i32, i32) {
    %c0_i32 = arith.constant 0 : i32
    %c0_i32_0 = arith.constant 0 : i32
    %c0_i32_1 = arith.constant 0 : i32
    return %c0_i32, %c0_i32_0 : i32, i32
  }
  func.func @transform_6(%arg0: i32) -> (i32, i32) {
    %c0_i32 = arith.constant 0 : i32
    %c0_i32_0 = arith.constant 0 : i32
    %c0_i32_1 = arith.constant 0 : i32
    return %c0_i32, %c0_i32_0 : i32, i32
  }
  func.func @transform_7(%arg0: i32) -> (i32, i32) {
    %c0_i32 = arith.constant 0 : i32
    %c0_i32_0 = arith.constant 0 : i32
    %c0_i32_1 = arith.constant 0 : i32
    return %c0_i32, %c0_i32_0 : i32, i32
  }
  func.func @transform_8(%arg0: i32) -> (i32, i32) {
    %c0_i32 = arith.constant 0 : i32
    %c0_i32_0 = arith.constant 0 : i32
    %c0_i32_1 = arith.constant 0 : i32
    return %c0_i32, %c0_i32_0 : i32, i32
  }
  func.func @transform_9(%arg0: i32) -> (i32, i32) {
    %c0_i32 = arith.constant 0 : i32
    %c0_i32_0 = arith.constant 0 : i32
    %c0_i32_1 = arith.constant 0 : i32
    return %c0_i32, %c0_i32_0 : i32, i32
  }
  func.func @transform_10(%arg0: i32) -> (i32, i32) {
    %c0_i32 = arith.constant 0 : i32
    %c0_i32_0 = arith.constant 0 : i32
    %c0_i32_1 = arith.constant 0 : i32
    return %c0_i32, %c0_i32_0 : i32, i32
  }
  func.func @transform_11(%arg0: i32) -> (i32, i32) {
    %c0_i32 = arith.constant 0 : i32
    %c0_i32_0 = arith.constant 0 : i32
    %c0_i32_1 = arith.constant 0 : i32
    return %c0_i32, %c0_i32_0 : i32, i32
  }
}

</mosaic_0001>

<bundles_post_ra>
// kernel: tpu_custom_call.1
= control target key start
LH: loop header
LB: loop body
LE: loop exit
PB: predicated region body
PF: predicated region fallthrough
CT: control target
= control target key end

     0   :  { %s2603_s0 = inlined_call_operand.hbm [shape: bf16[8,256], index: 0, kind: input, shape index: {}]   ;;  %s2604_s1 = inlined_call_operand.hbm [shape: bf16[256,512], index: 1, kind: input, shape index: {}]   ;;  %s2605_s2 = inlined_call_operand.hbm [shape: f32[1,512], index: 2, kind: input, shape index: {}]   ;;  %s2606_s3 = inlined_call_operand.vmem [shape: f32[1,512], index: 3, kind: input, shape index: {}]   ;;  %s2607_s4 = inlined_call_operand.hbm [shape: f32[1,512], index: 4, kind: input, shape index: {}]   ;;  %s2608_s5 = inlined_call_operand.hbm [shape: bf16[512,128], index: 5, kind: input, shape index: {}]   ;;  %s2609_s6 = inlined_call_operand.vmem [shape: f32[1,128], index: 6, kind: input, shape index: {}]   ;;  %s2610_s7 = inlined_call_operand.vmem [shape: f32[1,128], index: 7, kind: input, shape index: {}]   ;;  %s2611_s8 = inlined_call_operand.vmem [shape: f32[1,128], index: 8, kind: input, shape index: {}]   ;;  %s2612_s9 = inlined_call_operand.hbm [shape: bf16[128,128], index: 9, kind: input, shape index: {}]   ;;  %s2613_s10 = inlined_call_operand.vmem [shape: f32[1,128], index: 10, kind: input, shape index: {}]   ;;  %s2614_s11 = inlined_call_operand.hbm [shape: f32[8,128], index: 11, kind: output, shape index: {}]  }
   0x1   :  { %2618 = sst [smem:[#allocation21_spill]] %s2605_s2 }
   0x2   :  { %2619 = sst [smem:[#allocation22_spill]] %s2607_s4 }
   0x3   :  { %2620 = sst [smem:[#allocation23_spill]] %s2608_s5 }
   0x4   :  { %16 = vsyncpa [#allocation4], 0 }
   0x5   :  { %18 = vsyncpa [#allocation4 + $0x1], 0 }
   0x6   :  { %19 = vsyncpa [#allocation7], 0 }
   0x7   :  { %21 = vsyncpa [#allocation7 + $0x1], 0 }
   0x8   :  { %22 = vsyncpa [#allocation10], 0 }
   0x9   :  { %23 = vsyncpa [#allocation13], 0 }
   0xa   :  { %24 = vsyncpa [#allocation5], 0  ;;  %s2280_s17 = smov 0   ;;  %s2282_s18 = smov 0  }
   0xb   :  { %s2284_s19 = smov 0   ;;  %s2286_s20 = smov 0  }
   0xc LB: > { %s2205_s21 = smov [#allocation8]   ;;  %s2301_s23 = sadd.s32 4294967295, %s2203_s20   ;;  %s2203_s20 = sphi %s2286_s20, %s2641_s20   ;;  %s2199_s19 = sphi %s2284_s19, %s2640_s19   ;;  %s2195_s18 = sphi %s2282_s18, %s2639_s18   ;;  %s2191_s17 = sphi %s2280_s17, %s2638_s17  }
   0xd   : > { %s310_s22 = sshll.u32 %s2205_s21, 4  ;;  %p1589_p0 = scmp.ge.s32.totalorder %s2203_s20, 1  ;;  %s311_s22 = int_to_ptr.vmem [resolvable:$true] %s310_s22 }
   0xe   : > { %p2615_p1 = scmp.eq.s32.totalorder %s2301_s23, 0  ;;  %p297_p2 = scmp.lt.s32.totalorder %s2203_s20, 3 }
   0xf   : > { %s2206_s25 = smov [#allocation9]   ;;  %s2207_s27 = smov [#allocation11]  }
  0x10   : > { %p2307_p4 = pnand %p1589_p0, %p297_p2  ;;  %s324_s26 = sshll.u32 %s2206_s25, 4  ;;  %s325_s26 = int_to_ptr.vmem [resolvable:$true] %s324_s26 }
  0x11   : > { %s334_s28 = sshll.u32 %s2207_s27, 4  ;;  %s1976_s30 = scalar_lea.vmem %s311_s22, 64  ;;  %s2319_s28 = int_to_ptr.vmem [resolvable:$true] %s334_s28 }
  0x12   : > { %s2621_s24 = scalar_select %p2307_p4, 1, 0 }
  0x13   : > { %p1789_p5 = pneg %p2307_p4  ;;  %p1977_p8 = scmp.ne.s32.totalorder %s311_s22, %s1976_s30 }
  0x14   : > { %p1984_p11 = scmp.lt.s32.totalorder %s311_s22, %s311_s22  ;;  %p1985_p12 = scmp.lt.s32.totalorder %s1976_s30, %s1976_s30 }
  0x15   : > { %p2315_p6 = pnand %p1789_p5, %p2615_p1 }
  0x16   : > { %p1986_p13 = por %p1985_p12, %p1984_p11 }
  0x17   : > { %p1967_p7 = pneg %p2315_p6 }
  0x19   : > { %p1979_p9 = pnand %p1977_p8, %p1967_p7 }
  0x1b   : > { %p1980_p10 = pneg %p1979_p9 }
  0x1d   : > { %p1987_p0 = pnand %p1986_p13, %p1980_p10 }
  0x1f   : > { %1990 = shalt.err (!%p1987_p0)
}
  0x20   : > { %s2623_s2 = sld [smem:[#allocation21_spill]]  ;;  %s2002_s14 = scalar_lea.vmem %s325_s26, 64 }
  0x21   : > { %p2003_p2 = scmp.ne.s32.totalorder %s325_s26, %s2002_s14  ;;  %p2010_p8 = scmp.lt.s32.totalorder %s325_s26, %s325_s26 }
  0x22   : > { %p2011_p9 = scmp.lt.s32.totalorder %s2002_s14, %s2002_s14 }
  0x23   : > { %p2005_p5 = pnand %p2003_p2, %p1967_p7 }
  0x24   : > { %p2012_p1 = por %p2011_p9, %p2010_p8 }
  0x25   : > { %p2006_p3 = pneg %p2005_p5 }
  0x26   : > { %1792 = dma.hbm_to_vmem [thread:$0]  (!%p2315_p6), %s2623_s2, 64, %s311_s22, [#allocation7]  }
  0x27   : > { %p2013_p4 = pnand %p2012_p1, %p2006_p3 }
  0x29   : > { %2016 = shalt.err (!%p2013_p4)
}
  0x2a   : > { %s2624_s4 = sld [smem:[#allocation22_spill]]  ;;  %s2028_s21 = scalar_lea.vmem %s2319_s28, 4096 }
  0x2b   : > { %p2029_p10 = scmp.ne.s32.totalorder %s2319_s28, %s2028_s21  ;;  %p2036_p13 = scmp.lt.s32.totalorder %s2319_s28, %s2319_s28 }
  0x2c   : > { %p2037_p1 = scmp.lt.s32.totalorder %s2028_s21, %s2028_s21 }
  0x2d   : > { %p2031_p11 = pnand %p2029_p10, %p1967_p7 }
  0x2e   : > { %p2038_p3 = por %p2037_p1, %p2036_p13 }
  0x2f   : > { %p2032_p12 = pneg %p2031_p11 }
  0x30   : > { %1795 = dma.hbm_to_vmem [thread:$0]  (!%p2315_p6), %s2624_s4, 64, %s325_s26, [#allocation10]  }
  0x31   : > { %p2039_p4 = pnand %p2038_p3, %p2032_p12 }
  0x33   : > { %2042 = shalt.err (!%p2039_p4)
}
  0x34   : > { %s2208_s22 = smov 64   ;;  %s2209_s25 = smov 4  }
  0x35   : > { %s2625_s5 = sld [smem:[#allocation23_spill]]  ;;  %s2210_s30 = smov [#allocation12]  }
  0x36   : > { %s356_s12 = sshll.u32 %s2210_s30, 4  ;;  %s357_s12 = int_to_ptr.vmem [resolvable:$true] %s356_s12 }
  0x37   : > { %s2054_s13 = scalar_lea.vmem %s357_s12, 1024  ;;  %p2062_p8 = scmp.lt.s32.totalorder %s357_s12, %s357_s12 }
  0x38   : > { %p2055_p0 = scmp.ne.s32.totalorder %s357_s12, %s2054_s13  ;;  %p2063_p9 = scmp.lt.s32.totalorder %s2054_s13, %s2054_s13 }
  0x3a   : > { %p2057_p2 = pnand %p2055_p0, %p1967_p7  ;;  %p2064_p10 = por %p2063_p9, %p2062_p8 }
  0x3b   : > { %1798 = dma.hbm_to_vmem [thread:$0]  (!%p2315_p6), %s2625_s5, 4096, %s2319_s28, [#allocation10], %s2208_s22, %s2208_s22, %s2209_s25  }
  0x3c   : > { %p2058_p5 = pneg %p2057_p2 }
  0x3e   : > { %p2065_p11 = pnand %p2064_p10, %p2058_p5 }
  0x40   : > { %2068 = shalt.err (!%p2065_p11)
}
  0x41   : > { %1801 = dma.hbm_to_vmem [thread:$0]  (!%p2315_p6), %s2612_s9, 1024, %s357_s12, [#allocation13], %s2208_s22, %s2208_s22, %s2209_s25  }
  0x42   : > { %s2361_s28 = sadd.s32 1, %s2203_s20   ;;  %s37_s29 = sadd.s32 1, %s2199_s19 }
  0x43   : > { %s34_s16 = ssub.s32 %s2203_s20, %s2361_s28  ;;  %p44_p7 = scmp.ne.s32.totalorder %s2199_s19, %s2195_s18 }
  0x44   : > { %p35_p12 = scmp.eq.s32.totalorder %s34_s16, 0  ;;  %p45_p13 = scmp.eq.s32.totalorder %s2203_s20, 0 }
  0x45   : > { %p50_p1 = scmp.ne.s32.totalorder %s2195_s18, %s2191_s17  ;;  %p1813_p3 = scmp.lt.s32.totalorder %s2203_s20, 2 }
  0x46   : > { %s2373_s21 = scalar_select %p35_p12, %s2199_s19, %s37_s29  }
  0x47   : > { %p46_p4 = por %p45_p13, %p44_p7  ;;  %p2626_p0 = scmp.eq.s32.totalorder %s2301_s23, 0 }
  0x48   : > { %s2382_s26 = sand.u32 1, %s2199_s19   ;;  %s1596_s22 = sshll.u32 %s2203_s20, 6 }
  0x49   : > { %p2377_p2 = por %p2626_p0, %p50_p1  ;;  %s1595_s25 = sshll.u32 %s2382_s26, 2 }
  0x4a   : > { %s2389_s17 = scalar_lea.hbm %s2603_s0, %s1596_s22  ;;  %s377_s13 = scalar_lea.vmem [#allocation3], %s1595_s25 }
  0x4b   : > { %s2627_s27 = scalar_select %p2377_p2, 1, 0 }
  0x4c   : > { %s384_s14 = sshll.u32 %s377_s13, 4  ;;  %p2391_p6 = pnand %p1813_p3, %p46_p4  ;;  %s385_s14 = int_to_ptr.vmem [resolvable:$true] %s384_s14 }
  0x4d   : > { %s1597_s29 = sshll.u32 %s2382_s26, 8  ;;  %s374_s16 = scalar_lea.sflag [#allocation4], %s2382_s26 }
  0x4e   : > { %s2069_s2 = scalar_lea.hbm %s2389_s17, 64  ;;  %p2071_p8 = pneg %p2391_p6 }
  0x4f   : > { %p2070_p5 = scmp.ne.s32.totalorder %s2389_s17, %s2069_s2  ;;  %s2074_s30 = scalar_lea.hbm %s2603_s0, 128 }
  0x50   : > { %p2075_p11 = scmp.lt.s32.totalorder %s2389_s17, %s2603_s0  ;;  %p2076_p7 = scmp.lt.s32.totalorder %s2074_s30, %s2069_s2 }
  0x51   : > { %p2072_p9 = pnand %p2071_p8, %p2070_p5 }
  0x52   : > { %p2077_p12 = por %p2076_p7, %p2075_p11 }
  0x53   : > { %p2073_p10 = pneg %p2072_p9 }
  0x55   : > { %p2078_p13 = pnand %p2077_p12, %p2073_p10 }
  0x57   : > { %2081 = shalt.err (!%p2078_p13)
}
  0x58   : > { %s2082_s26 = scalar_lea.vmem %s385_s14, 64  ;;  %s2211_s4 = smov [#allocation3]  }
  0x59   : > { %p2083_p1 = scmp.ne.s32.totalorder %s385_s14, %s2082_s26  ;;  %s2087_s5 = sshll.u32 %s2211_s4, 4  ;;  %s2088_s5 = int_to_ptr.vmem [resolvable:$false] %s2087_s5 }
  0x5a   : > { %s2089_s22 = scalar_lea.vmem %s2088_s5, 128  ;;  %p2090_p0 = scmp.lt.s32.totalorder %s385_s14, %s2088_s5 }
  0x5b   : > { %p2085_p3 = pnand %p2083_p1, %p2071_p8  ;;  %p2091_p5 = scmp.lt.s32.totalorder %s2089_s22, %s2082_s26 }
  0x5d   : > { %p2086_p4 = pneg %p2085_p3  ;;  %p2092_p9 = por %p2091_p5, %p2090_p0 }
  0x5f   : > { %p2093_p2 = pnand %p2092_p9, %p2086_p4 }
  0x61   : > { %2096 = shalt.err (!%p2093_p2)
}
  0x62   : > { %1805 = dma.hbm_to_vmem [thread:$0]  (!%p2391_p6), %s2389_s17, 64, %s385_s14, %s374_s16  }
  0x63   : > { %s395_s2 = scalar_lea.vmem [#allocation6], %s1597_s29  ;;  %s391_s30 = sand.u32 1, %s2203_s20  }
  0x64   : > { %s403_s25 = sshll.u32 %s395_s2, 4  ;;  %s1691_s4 = sshll.u32 %s2203_s20, 12  ;;  %s2418_s25 = int_to_ptr.vmem [resolvable:$true] %s403_s25 }
  0x65   : > { %s2424_s5 = scalar_lea.hbm %s2604_s1, %s1691_s4  ;;  %s2426_s26 = scalar_lea.sflag [#allocation7], %s391_s30 }
  0x66   : > { %s2097_s22 = scalar_lea.hbm %s2424_s5, 4096  ;;  %s2102_s20 = scalar_lea.hbm %s2604_s1, 8192 }
  0x67   : > { %p2098_p2 = scmp.ne.s32.totalorder %s2424_s5, %s2097_s22  ;;  %p2103_p7 = scmp.lt.s32.totalorder %s2424_s5, %s2604_s1 }
  0x68   : > { %p2104_p12 = scmp.lt.s32.totalorder %s2102_s20, %s2097_s22 }
  0x69   : > { %p2100_p10 = pnand %p2098_p2, %p2071_p8 }
  0x6a   : > { %p2105_p13 = por %p2104_p12, %p2103_p7 }
  0x6b   : > { %p2101_p11 = pneg %p2100_p10 }
  0x6d   : > { %p2106_p1 = pnand %p2105_p13, %p2101_p11 }
  0x6f   : > { %2109 = shalt.err (!%p2106_p1)
}
  0x70   : > { %s2110_s2 = scalar_lea.vmem %s2418_s25, 4096  ;;  %s2212_s30 = smov [#allocation6]  }
  0x71   : > { %p2111_p3 = scmp.ne.s32.totalorder %s2418_s25, %s2110_s2  ;;  %s2115_s4 = sshll.u32 %s2212_s30, 4  ;;  %s2116_s4 = int_to_ptr.vmem [resolvable:$false] %s2115_s4 }
  0x72   : > { %s2117_s12 = scalar_lea.vmem %s2116_s4, 8192  ;;  %p2118_p5 = scmp.lt.s32.totalorder %s2418_s25, %s2116_s4 }
  0x73   : > { %p2113_p4 = pnand %p2111_p3, %p2071_p8  ;;  %p2119_p9 = scmp.lt.s32.totalorder %s2117_s12, %s2110_s2 }
  0x75   : > { %p2114_p0 = pneg %p2113_p4  ;;  %p2120_p2 = por %p2119_p9, %p2118_p5 }
  0x77   : > { %p2121_p10 = pnand %p2120_p2, %p2114_p0 }
  0x79   : > { %2124 = shalt.err (!%p2121_p10)
}
  0x7a   : > { %s2213_s13 = smov 256   ;;  %s2214_s22 = smov 16  }
  0x7b   : > { %1808 = dma.hbm_to_vmem [thread:$0]  (!%p2391_p6), %s2424_s5, 4096, %s2418_s25, %s2426_s26, %s2213_s13, %s2213_s13, %s2214_s22  }
  0x7c   : > { %p2629_p8 = scmp.ne.s32.totalorder %s2621_s24, 0 }
  0x7d   : > { %s417_s17 = sand.u32 (!%p2629_p8), 1, %s2195_s18   ;;  %p2630_p11 = scmp.ne.s32.totalorder (!%p2629_p8), %s2627_s27, 0 }
  0x7e   : > { %415 = sbr.rel (%p2629_p8) target bundleno = 1077 (0x435), region = 64  ;;  %s1602_s14 = sshll.u32 (!%p2629_p8), %s417_s17, 2 }
  0x7f   : > { %s418_s20 = scalar_lea.sflag (!%p2629_p8), [#allocation4], %s417_s17  ;;  %s2454_s29 = scalar_lea.vmem (!%p2629_p8), [#allocation3], %s1602_s14 }
  0x83   : > { %2166 = dma.done.wait (%p2630_p11), %s418_s20, 64  }
  0x84   : > { %2168 = vsyncadd (%p2630_p11), %s418_s20, 4294967232  ;;  %s426_s16 = sand.u32 1, %s2301_s23   ;;  %s1603_s15 = sshll.u32 %s417_s17, 8 }
  0x85   : > { %s427_s25 = scalar_lea.sflag [#allocation7], %s426_s16  ;;  %s2461_s5 = scalar_lea.vmem [#allocation6], %s1603_s15 }
  0x86   : > { %2170 = dma.done.wait (%p2630_p11), %s427_s25, 4096  }
  0x87   : > { %2172 = vsyncadd (%p2630_p11), %s427_s25, 4294963200  ;;  %p2631_p6 = scmp.eq.s32.totalorder %s2301_s23, 0 }
  0x89   : > { %2174 = dma.done.wait (%p2631_p6), [#allocation7], 64   ;;  %p2632_p7 = pmov %p2631_p6 }
  0x8a   : > { %p2633_p12 = pmov %p2631_p6 }
  0x8b   : > { %2176 = vsyncadd (%p2632_p7), [#allocation7], 4294967232 }
  0x8c   : > { %2178 = dma.done.wait (%p2633_p12), [#allocation10], 4160   ;;  %p2634_p13 = pmov %p2631_p6 }
  0x8d   : > { %p2635_p1 = pmov %p2631_p6 }
  0x8e   : > { %2180 = vsyncadd (%p2634_p13), [#allocation10], 4294963136 }
  0x8f   : > { %2182 = dma.done.wait (%p2635_p1), [#allocation13], 1024   ;;  %p2636_p3 = pmov %p2635_p1 }
  0x90   : > { %p2637_p4 = scmp.ne.s32.totalorder %s2301_s23, 0 }
  0x91   : > { %2184 = vsyncadd (%p2636_p3), [#allocation13], 4294966272 }
  0x92   : > { %490 = sbr.rel (%p2637_p4) target bundleno = 154 (0x9a), region = 92 }
  0x97   : > { %v2215_v0 = vmov 0.0  }
  0x98   : > { %491 = vst [vmem:[#allocation2 + $0x10] sm:$0xff] %v2215_v0  ;;  %492 = vst [vmem:[#allocation2] sm:$0xff] %v2215_v0 }
  0x99   : > { %493 = vst [vmem:[#allocation2 + $0x18] sm:$0xff] %v2215_v0  ;;  %494 = vst [vmem:[#allocation2 + $0x8] sm:$0xff] %v2215_v0 }
  0x9a PF: > { %v1865_v1 = vld [vmem:[%s2461_s5 + $0xe4] ss:$16 sps:$4 sm:$0xff]   ;;  %v1867_v2 = vld [vmem:[%s2461_s5 + $0xec] ss:$16 sps:$4 sm:$0xff]   ;;  %v2216_v3 = vmov 0   ;;  %p1641_p0 = scmp.ne.s32.totalorder %s2301_s23, 1 }
  0x9b   : > { %724 = vmatprep.mubr.bf16.mxu0 %v2216_v3  ;;  %765 = vmatprep.mubr.bf16.mxu1 %v2216_v3  ;;  %v1869_v4 = vld [vmem:[%s2461_s5 + $0xe0] ss:$16 sps:$4 sm:$0xff]   ;;  %v1870_v5 = vld [vmem:[%s2461_s5 + $0xe8] ss:$16 sps:$4 sm:$0xff]   ;;  %v1871_v6 = vld [vmem:[%s2461_s5 + $0xc4] ss:$16 sps:$4 sm:$0xff]  }
  0x9c   : > { %692 = vmatprep.subr.bf16.mxu0 %v1865_v1  ;;  %733 = vmatprep.subr.bf16.mxu1 %v1867_v2  ;;  %v1873_v7 = vld [vmem:[%s2461_s5 + $0xcc] ss:$16 sps:$4 sm:$0xff]   ;;  %v1875_v8 = vld [vmem:[%s2461_s5 + $0xc0] ss:$16 sps:$4 sm:$0xff]   ;;  %v1876_v9 = vld [vmem:[%s2461_s5 + $0xc8] ss:$16 sps:$4 sm:$0xff]  }
  0x9d   : > { %693 = vmatpush1.bf16.msra.mxu0 %v1869_v4  ;;  %734 = vmatpush1.bf16.msra.mxu1 %v1870_v5  ;;  %v1877_v10 = vld [vmem:[%s2461_s5 + $0xa4] ss:$16 sps:$4 sm:$0xff]   ;;  %v1879_v11 = vld [vmem:[%s2461_s5 + $0xac] ss:$16 sps:$4 sm:$0xff]   ;;  %v1881_v12 = vld [vmem:[%s2461_s5 + $0xa0] ss:$16 sps:$4 sm:$0xff]  }
  0x9e   : > { %694 = vmatprep.subr.bf16.mxu0 %v1871_v6  ;;  %735 = vmatprep.subr.bf16.mxu1 %v1873_v7  ;;  %v1882_v13 = vld [vmem:[%s2461_s5 + $0xa8] ss:$16 sps:$4 sm:$0xff]   ;;  %v1883_v14 = vld [vmem:[%s2461_s5 + $0x84] ss:$16 sps:$4 sm:$0xff]   ;;  %v1885_v15 = vld [vmem:[%s2461_s5 + $0x8c] ss:$16 sps:$4 sm:$0xff]  }
  0x9f   : > { %v1887_v16 = vld [vmem:[%s2461_s5 + $0x80] ss:$16 sps:$4 sm:$0xff]   ;;  %v1888_v17 = vld [vmem:[%s2461_s5 + $0x88] ss:$16 sps:$4 sm:$0xff]   ;;  %v1889_v18 = vld [vmem:[%s2461_s5 + $0x64] ss:$16 sps:$4 sm:$0xff]  }
  0xa0   : > { %v1891_v19 = vld [vmem:[%s2461_s5 + $0x6c] ss:$16 sps:$4 sm:$0xff]   ;;  %v1893_v20 = vld [vmem:[%s2461_s5 + $0x60] ss:$16 sps:$4 sm:$0xff]   ;;  %v1894_v21 = vld [vmem:[%s2461_s5 + $0x68] ss:$16 sps:$4 sm:$0xff]  }
  0xa1   : > { %695 = vmatpush1.bf16.msra.mxu0 %v1875_v8  ;;  %736 = vmatpush1.bf16.msra.mxu1 %v1876_v9  ;;  %v1895_v22 = vld [vmem:[%s2461_s5 + $0x44] ss:$16 sps:$4 sm:$0xff]   ;;  %v1897_v23 = vld [vmem:[%s2461_s5 + $0x4c] ss:$16 sps:$4 sm:$0xff]   ;;  %v1899_v24 = vld [vmem:[%s2461_s5 + $0x40] ss:$16 sps:$4 sm:$0xff]  }
  0xa2   : > { %696 = vmatprep.subr.bf16.mxu0 %v1877_v10  ;;  %737 = vmatprep.subr.bf16.mxu1 %v1879_v11  ;;  %v1900_v25 = vld [vmem:[%s2461_s5 + $0x48] ss:$16 sps:$4 sm:$0xff]   ;;  %v1901_v26 = vld [vmem:[%s2461_s5 + $0x24] ss:$16 sps:$4 sm:$0xff]   ;;  %v1903_v27 = vld [vmem:[%s2461_s5 + $0x2c] ss:$16 sps:$4 sm:$0xff]  }
  0xa3   : > { %v1905_v28 = vld [vmem:[%s2461_s5 + $0x20] ss:$16 sps:$4 sm:$0xff]   ;;  %v1906_v29 = vld [vmem:[%s2461_s5 + $0x28] ss:$16 sps:$4 sm:$0xff]   ;;  %v1907_v30 = vld [vmem:[%s2461_s5 + $0x4] ss:$16 sps:$4 sm:$0xff]  }
  0xa4   : > { %v1909_v31 = vld [vmem:[%s2461_s5 + $0xc] ss:$16 sps:$4 sm:$0xff]   ;;  %v1911_v32 = vld [vmem:[%s2461_s5] ss:$16 sps:$4 sm:$0xff]   ;;  %v1912_v33 = vld [vmem:[%s2461_s5 + $0x8] ss:$16 sps:$4 sm:$0xff]  }
  0xa5   : > { %697 = vmatpush1.bf16.msra.mxu0 %v1881_v12  ;;  %738 = vmatpush1.bf16.msra.mxu1 %v1882_v13  ;;  %v499_v34 = vld [vmem:[%s2454_s29] sm:$0xf]  ;;  %v495_v35 = vld [vmem:[#allocation2 + $0x10] sm:$0xff]  ;;  %v497_v36 = vld [vmem:[#allocation2 + $0x18] sm:$0xff] }
  0xa6   : > { %698 = vmatprep.subr.bf16.mxu0 %v1883_v14  ;;  %739 = vmatprep.subr.bf16.mxu1 %v1885_v15  ;;  %v496_v39 = vld [vmem:[#allocation2] sm:$0xff]  ;;  %v498_v40 = vld [vmem:[#allocation2 + $0x8] sm:$0xff] }
  0xa9   : > { %699 = vmatpush1.bf16.msra.mxu0 %v1887_v16  ;;  %740 = vmatpush1.bf16.msra.mxu1 %v1888_v17 }
  0xaa   : > { %700 = vmatprep.subr.bf16.mxu0 %v1889_v18  ;;  %741 = vmatprep.subr.bf16.mxu1 %v1891_v19 }
  0xad   : > { %701 = vmatpush1.bf16.msra.mxu0 %v1893_v20  ;;  %742 = vmatpush1.bf16.msra.mxu1 %v1894_v21 }
  0xae   : > { %702 = vmatprep.subr.bf16.mxu0 %v1895_v22  ;;  %743 = vmatprep.subr.bf16.mxu1 %v1897_v23 }
  0xb1   : > { %703 = vmatpush1.bf16.msra.mxu0 %v1899_v24  ;;  %744 = vmatpush1.bf16.msra.mxu1 %v1900_v25 }
  0xb2   : > { %704 = vmatprep.subr.bf16.mxu0 %v1901_v26  ;;  %745 = vmatprep.subr.bf16.mxu1 %v1903_v27 }
  0xb5   : > { %705 = vmatpush1.bf16.msra.mxu0 %v1905_v28  ;;  %746 = vmatpush1.bf16.msra.mxu1 %v1906_v29 }
  0xb6   : > { %706 = vmatprep.subr.bf16.mxu0 %v1907_v30  ;;  %747 = vmatprep.subr.bf16.mxu1 %v1909_v31 }
  0xb9   : > { %707 = vmatpush1.bf16.msra.mxu0 %v1911_v32  ;;  %748 = vmatpush1.bf16.msra.mxu1 %v1912_v33 }
  0xbc   : > { %725 = vmatmul.mubr.bf16.vlgmr.msra.gmra.mxu0 %v499_v34  ;;  %766 = vmatmul.mubr.bf16.vlgmr.msra.gmra.mxu1 %v499_v34 }
 0x17c   : > { %v726_v37 = vpop.f32.mrf.mxu0  ;;  %v767_v38 = vpop.f32.mrf.mxu1 }
 0x17d   : > { %v774_v41 = vadd.f32 %v726_v37, %v495_v35  ;;  %v776_v42 = vadd.f32 %v767_v38, %v497_v36 }
 0x17e   : > { %v728_v43 = vpop.f32.mrf.mxu0  ;;  %v769_v44 = vpop.f32.mrf.mxu1  ;;  %785 = sbr.rel (%p1641_p0) target bundleno = 1062 (0x426), region = 96 }
 0x17f   : > { %778 = vst [vmem:[#allocation2 + $0x10] sm:$0xff] %v774_v41  ;;  %780 = vst [vmem:[#allocation2 + $0x18] sm:$0xff] %v776_v42  ;;  %v775_v45 = vadd.f32 %v728_v43, %v496_v39  ;;  %v777_v46 = vadd.f32 %v769_v44, %v498_v40 }
 0x180   : > { %v730_v47 = vpop.f32.mrf.mxu0  ;;  %v771_v48 = vpop.f32.mrf.mxu1 }
 0x181   : > { %779 = vst [vmem:[#allocation2] sm:$0xff] %v775_v45  ;;  %781 = vst [vmem:[#allocation2 + $0x8] sm:$0xff] %v777_v46 }
 0x182   : > { %v731_v49 = vpop.f32.mrf.mxu0  ;;  %v772_v50 = vpop.f32.mrf.mxu1 }
 0x183   : > { %v1913_v51 = vld [vmem:[#allocation11 + $0x78] sm:$0xff]   ;;  %v1917_v55 = vld [vmem:[#allocation11 + $0x70] sm:$0xff]   ;;  %v1921_v59 = vld [vmem:[#allocation11 + $0x68] sm:$0xff]   ;;  %v792_v8 = vlaneseq  ;;  %vm2218_vm0 = vmmov 0  }
 0x184   : > { %v1914_v52 = vld [vmem:[#allocation11 + $0xf8] sm:$0xff]   ;;  %1692 = vmatprep.subr.bf16.mxu0 %v1913_v51  ;;  %v1918_v56 = vld [vmem:[#allocation11 + $0xf0] sm:$0xff]   ;;  %v1922_v60 = vld [vmem:[#allocation11 + $0xe8] sm:$0xff]  }
 0x185   : > { %v1915_v53 = vld [vmem:[#allocation11 + $0x38] sm:$0xff]   ;;  %1714 = vmatprep.subr.bf16.mxu1 %v1914_v52  ;;  %v1919_v57 = vld [vmem:[#allocation11 + $0x30] sm:$0xff]   ;;  %v1923_v61 = vld [vmem:[#allocation11 + $0x28] sm:$0xff]   ;;  %v793_v13 = vshrl.u32 %v792_v8, 7 }
 0x186   : > { %v1916_v54 = vld [vmem:[#allocation11 + $0xb8] sm:$0xff]   ;;  %1693 = vmatpush3.bf16.msra.mxu0 %v1915_v53  ;;  %v1920_v58 = vld [vmem:[#allocation11 + $0xb0] sm:$0xff]   ;;  %v1924_v62 = vld [vmem:[#allocation11 + $0xa8] sm:$0xff]  }
 0x187   : > { %1715 = vmatpush3.bf16.msra.mxu1 %v1916_v54  ;;  %1694 = vmatprep.subr.bf16.mxu0 %v1917_v55  ;;  %v1925_v63 = vld [vmem:[#allocation11 + $0x60] sm:$0xff]   ;;  %v1929_v3 = vld [vmem:[#allocation11 + $0x58] sm:$0xff]   ;;  %v1933_v7 = vld [vmem:[#allocation11 + $0x50] sm:$0xff]   ;;  %v2515_v18 = vsub.s32 1, %v793_v13  ;;  %v2517_v20 = vsub.s32 3, %v793_v13  ;;  %v2519_v22 = vsub.s32 0, %v793_v13 }
 0x188   : > { %1716 = vmatprep.subr.bf16.mxu1 %v1918_v56  ;;  %v1926_v0 = vld [vmem:[#allocation11 + $0xe0] sm:$0xff]   ;;  %v1930_v4 = vld [vmem:[#allocation11 + $0xd8] sm:$0xff]   ;;  %v1934_v9 = vld [vmem:[#allocation11 + $0xd0] sm:$0xff]   ;;  %v2521_v24 = vsub.s32 2, %v793_v13 }
 0x189   : > { %v1927_v1 = vld [vmem:[#allocation11 + $0x20] sm:$0xff]   ;;  %v1931_v5 = vld [vmem:[#allocation11 + $0x18] sm:$0xff]   ;;  %v1935_v10 = vld [vmem:[#allocation11 + $0x10] sm:$0xff]  }
 0x18a   : > { %1695 = vmatpush3.bf16.msra.mxu0 %v1919_v57  ;;  %v1928_v2 = vld [vmem:[#allocation11 + $0xa0] sm:$0xff]   ;;  %v1932_v6 = vld [vmem:[#allocation11 + $0x98] sm:$0xff]   ;;  %v1936_v11 = vld [vmem:[#allocation11 + $0x90] sm:$0xff]  }
 0x18b   : > { %1717 = vmatpush3.bf16.msra.mxu1 %v1920_v58  ;;  %1696 = vmatprep.subr.bf16.mxu0 %v1921_v59  ;;  %v1937_v12 = vld [vmem:[#allocation11 + $0x48] sm:$0xff]   ;;  %v1941_v17 = vld [vmem:[#allocation11 + $0x40] sm:$0xff]   ;;  %v787_v25 = vld [vmem:[#allocation2] sm:$0xff] }
 0x18c   : > { %1718 = vmatprep.subr.bf16.mxu1 %v1922_v60  ;;  %v1938_v14 = vld [vmem:[#allocation11 + $0xc8] sm:$0xff]   ;;  %v1942_v19 = vld [vmem:[#allocation11 + $0xc0] sm:$0xff]   ;;  %v790_v26 = vld [vmem:[#allocation8] sm:$0xf] }
 0x18d   : > { %v1939_v15 = vld [vmem:[#allocation11 + $0x8] sm:$0xff]   ;;  %v1943_v21 = vld [vmem:[#allocation11] sm:$0xff]   ;;  %v799_v27 = vrot.slane %v790_v26, %v2515_v18  ;;  %v789_v28 = vld [vmem:[#allocation2 + $0x8] sm:$0xff]  ;;  %v807_v29 = vrot.slane %v790_v26, %v2517_v20  ;;  %v795_v31 = vrot.slane %v790_v26, %v2519_v22  ;;  %v803_v35 = vrot.slane %v790_v26, %v2521_v24 }
 0x18e   : > { %1697 = vmatpush3.bf16.msra.mxu0 %v1923_v61  ;;  %v1940_v16 = vld [vmem:[#allocation11 + $0x88] sm:$0xff]   ;;  %v1944_v23 = vld [vmem:[#allocation11 + $0x80] sm:$0xff]  }
 0x18f   : > { %1719 = vmatpush3.bf16.msra.mxu1 %v1924_v62  ;;  %1698 = vmatprep.subr.bf16.mxu0 %v1925_v63  ;;  %v786_v30 = vld [vmem:[#allocation2 + $0x10] sm:$0xff]  ;;  %v788_v32 = vld [vmem:[#allocation2 + $0x18] sm:$0xff]  ;;  %v2526_v33 = vadd.f32 %v799_v27, %v787_v25  ;;  %v2528_v34 = vadd.f32 %v807_v29, %v789_v28 }
 0x190   : > { %1720 = vmatprep.subr.bf16.mxu1 %v1926_v0  ;;  %v2531_v36 = vadd.f32 %v795_v31, %v786_v30  ;;  %v2542_v43 = vadd.f32 %v803_v35, %v788_v32 }
 0x191   : > { %v822_v37 = vrot.slane %v2526_v33, 4  ;;  %v846_v38 = vmul.f32 %v2526_v33, %v2526_v33  ;;  %v834_v39 = vrot.slane %v2528_v34, 4  ;;  %v848_v40 = vmul.f32 %v2528_v34, %v2528_v34 }
 0x192   : > { %1699 = vmatpush3.bf16.msra.mxu0 %v1927_v1  ;;  %v816_v41 = vrot.slane %v2531_v36, 4  ;;  %v845_v42 = vmul.f32 %v2531_v36, %v2531_v36  ;;  %v828_v50 = vrot.slane %v2542_v43, 4  ;;  %v847_v51 = vmul.f32 %v2542_v43, %v2542_v43 }
 0x193   : > { %1721 = vmatpush3.bf16.msra.mxu1 %v1928_v2  ;;  %1700 = vmatprep.subr.bf16.mxu0 %v1929_v3  ;;  %v823_v44 = vadd.f32 %v822_v37, %v2526_v33  ;;  %v855_v45 = vrot.slane %v846_v38, 4  ;;  %v835_v46 = vadd.f32 %v834_v39, %v2528_v34  ;;  %v867_v47 = vrot.slane %v848_v40, 4 }
 0x194   : > { %1722 = vmatprep.subr.bf16.mxu1 %v1930_v4  ;;  %v817_v48 = vadd.f32 %v816_v41, %v2531_v36  ;;  %v849_v49 = vrot.slane %v845_v42, 4  ;;  %v829_v58 = vadd.f32 %v828_v50, %v2542_v43  ;;  %v861_v59 = vrot.slane %v847_v51, 4 }
 0x195   : > { %v824_v52 = vrot.slane %v823_v44, 2  ;;  %v856_v53 = vadd.f32 %v855_v45, %v846_v38  ;;  %v836_v54 = vrot.slane %v835_v46, 2  ;;  %v868_v55 = vadd.f32 %v867_v47, %v848_v40 }
 0x196   : > { %1701 = vmatpush3.bf16.msra.mxu0 %v1931_v5  ;;  %v818_v56 = vrot.slane %v817_v48, 2  ;;  %v850_v57 = vadd.f32 %v849_v49, %v845_v42  ;;  %v830_v2 = vrot.slane %v829_v58, 2  ;;  %v862_v3 = vadd.f32 %v861_v59, %v847_v51 }
 0x197   : > { %1723 = vmatpush3.bf16.msra.mxu1 %v1932_v6  ;;  %1702 = vmatprep.subr.bf16.mxu0 %v1933_v7  ;;  %v825_v60 = vadd.f32 %v824_v52, %v823_v44  ;;  %v857_v61 = vrot.slane %v856_v53, 2  ;;  %v837_v62 = vadd.f32 %v836_v54, %v835_v46  ;;  %v869_v63 = vrot.slane %v868_v55, 2 }
 0x198   : > { %1724 = vmatprep.subr.bf16.mxu1 %v1934_v9  ;;  %v819_v0 = vadd.f32 %v818_v56, %v817_v48  ;;  %v851_v1 = vrot.slane %v850_v57, 2 }
 0x199   : > { %v826_v4 = vrot.slane %v825_v60, 1  ;;  %v858_v5 = vadd.f32 %v857_v61, %v856_v53  ;;  %v838_v6 = vrot.slane %v837_v62, 1  ;;  %v870_v7 = vadd.f32 %v869_v63, %v868_v55 }
 0x19a   : > { %1703 = vmatpush3.bf16.msra.mxu0 %v1935_v10  ;;  %v820_v8 = vrot.slane %v819_v0, 1  ;;  %v852_v9 = vadd.f32 %v851_v1, %v850_v57  ;;  %v831_v10 = vadd.f32 %v830_v2, %v829_v58  ;;  %v905_v58 = vld [vmem:[%s2606_s3] sm:$0xf] }
 0x19b   : > { %1725 = vmatpush3.bf16.msra.mxu1 %v1936_v11  ;;  %1704 = vmatprep.subr.bf16.mxu0 %v1937_v12  ;;  %v863_v11 = vrot.slane %v862_v3, 2  ;;  %v827_v12 = vadd.f32 %v826_v4, %v825_v60  ;;  %v859_v13 = vrot.slane %v858_v5, 1  ;;  %v931_v60 = vld [vmem:[#allocation9] sm:$0xf]  ;;  %v922_v1 = vrot.slane %v905_v58, %v2517_v20 }
 0x19c   : > { %1726 = vmatprep.subr.bf16.mxu1 %v1938_v14  ;;  %v839_v14 = vadd.f32 %v838_v6, %v837_v62  ;;  %v914_v62 = vrot.slane %v905_v58, %v2515_v18  ;;  %v940_v4 = vrot.slane %v931_v60, %v2515_v18  ;;  %v944_v18 = vrot.slane %v931_v60, %v2521_v24 }
 0x19d   : > { %v860_v25 = vadd.f32 %v859_v13, %v858_v5  ;;  %v910_v5 = vrot.slane %v905_v58, %v2519_v22 }
 0x19e   : > { %1705 = vmatpush3.bf16.msra.mxu0 %v1939_v15  ;;  %v871_v15 = vrot.slane %v870_v7, 1  ;;  %v844_v26 = vmul.f32 0.125, %v839_v14 }
 0x19f   : > { %1727 = vmatpush3.bf16.msra.mxu1 %v1940_v16  ;;  %1706 = vmatprep.subr.bf16.mxu0 %v1941_v17  ;;  %v821_v16 = vadd.f32 %v820_v8, %v819_v0  ;;  %v853_v17 = vrot.slane %v852_v9, 1  ;;  %v874_v32 = vmul.f32 0.125, %v860_v25  ;;  %v948_v8 = vrot.slane %v931_v60, %v2517_v20 }
 0x1a0   : > { %1728 = vmatprep.subr.bf16.mxu1 %v1942_v19  ;;  %v832_v19 = vrot.slane %v831_v10, 1  ;;  %v872_v27 = vadd.f32 %v871_v15, %v870_v7  ;;  %v880_v38 = vmul.f32 %v844_v26, %v844_v26  ;;  %v892_v61 = vsub.f32 %v2528_v34, %v844_v26 }
 0x1a1   : > { %v841_v28 = vmul.f32 0.125, %v821_v16  ;;  %v854_v29 = vadd.f32 %v853_v17, %v852_v9 }
 0x1a2   : > { %1707 = vmatpush3.bf16.msra.mxu0 %v1943_v21  ;;  %v864_v21 = vadd.f32 %v863_v11, %v862_v3  ;;  %v833_v30 = vadd.f32 %v832_v19, %v831_v10  ;;  %v876_v37 = vmul.f32 0.125, %v872_v27  ;;  %v936_v10 = vrot.slane %v931_v60, %v2519_v22 }
 0x1a3   : > { %1729 = vmatpush3.bf16.msra.mxu1 %v1944_v23  ;;  %v842_v23 = vmul.f32 0.125, %v827_v12  ;;  %v873_v39 = vmul.f32 0.125, %v854_v29  ;;  %v877_v40 = vmul.f32 %v841_v28, %v841_v28  ;;  %v889_v63 = vsub.f32 %v2531_v36, %v841_v28  ;;  %v1945_v29 = vld [vmem:[#allocation12 + $0x38] sm:$0xff]  }
 0x1a4   : > { %v865_v31 = vrot.slane %v864_v21, 1  ;;  %v843_v42 = vmul.f32 0.125, %v833_v30  ;;  %v884_v45 = vsub.f32 %v876_v37, %v880_v38  ;;  %v918_v36 = vrot.slane %v905_v58, %v2521_v24  ;;  %v1946_v24 = vld [vmem:[#allocation12 + $0x30] sm:$0xff]   ;;  %v1951_v38 = vld [vmem:[#allocation12 + $0x8] sm:$0xff]  }
 0x1a5   : > { %v878_v35 = vmul.f32 %v842_v23, %v842_v23  ;;  %v881_v46 = vsub.f32 %v873_v39, %v877_v40  ;;  %v890_v59 = vsub.f32 %v2526_v33, %v842_v23  ;;  %v2217_v30 = vmov 0.0   ;;  %v1950_v37 = vld [vmem:[#allocation12 + $0x10] sm:$0xff]   ;;  %v1952_v39 = vld [vmem:[#allocation12] sm:$0xff]  }
 0x1a6   : > { %v866_v44 = vadd.f32 %v865_v31, %v864_v21  ;;  %v879_v49 = vmul.f32 %v843_v42, %v843_v42  ;;  %v888_v50 = vmax.f32 %v884_v45, 0.0  ;;  %v891_v6 = vsub.f32 %v2542_v43, %v843_v42  ;;  %1745 = vmatprep.subr.bf16.mxu0 %v2217_v30  ;;  %v1947_v31 = vld [vmem:[#allocation12 + $0x28] sm:$0xff]   ;;  %v1642_v42 = vld [vmem:[%s2609_s6] ss:$0 sm:$0xff] }
 0x1a7   : > { %v882_v41 = vsub.f32 %v874_v32, %v878_v35  ;;  %v885_v51 = vmax.f32 %v881_v46, 0.0  ;;  %v1948_v32 = vld [vmem:[#allocation12 + $0x20] sm:$0xff]   ;;  %v1949_v35 = vld [vmem:[#allocation12 + $0x18] sm:$0xff]  }
 0x1a8   : > { %v875_v48 = vmul.f32 0.125, %v866_v44  ;;  %v896_v54 = vadd.f32 1e-05, %v888_v50 }
 0x1a9   : > { %v886_v47 = vmax.f32 %v882_v41, 0.0  ;;  %v893_v55 = vadd.f32 1e-05, %v885_v51 }
 0x1aa   : > { %v883_v53 = vsub.f32 %v875_v48, %v879_v49 }
 0x1ab   : > { %v894_v52 = vadd.f32 1e-05, %v886_v47 }
 0x1ac   : > { %v887_v56 = vmax.f32 %v883_v53, 0.0 }
 0x1ad   : > { %1953 = vrsqrt.f32 %v894_v52 }
 0x1ae   : > { %1955 = vrsqrt.f32 %v896_v54  ;;  %v895_v57 = vadd.f32 1e-05, %v887_v56 }
 0x1af   : > { %1957 = vrsqrt.f32 %v893_v55 }
 0x1b0   : > { %1959 = vrsqrt.f32 %v895_v57 }
 0x1ba   : > { %v1954_v0 = vpop.eup %1953 }
 0x1bb   : > { %v1956_v2 = vpop.eup %1955  ;;  %v902_v3 = vmul.f32 %v1954_v0, %v890_v59 }
 0x1bc   : > { %v1958_v7 = vpop.eup %1957  ;;  %v904_v33 = vmul.f32 %v1956_v2, %v892_v61 }
 0x1bd   : > { %v928_v34 = vmul.f32 %v914_v62, %v902_v3  ;;  %v901_v9 = vmul.f32 %v1958_v7, %v889_v63  ;;  %v1960_v11 = vpop.eup %1959 }
 0x1be   : > { %v930_v12 = vmul.f32 %v922_v1, %v904_v33  ;;  %v903_v15 = vmul.f32 %v1960_v11, %v891_v6 }
 0x1bf   : > { %v954_v13 = vadd.f32 %v940_v4, %v928_v34  ;;  %v927_v14 = vmul.f32 %v910_v5, %v901_v9  ;;  %v1675_v9 = vld [vmem:[%s2610_s7] ss:$0 sm:$0xff] }
 0x1c0   : > { %v956_v16 = vadd.f32 %v948_v8, %v930_v12  ;;  %v929_v19 = vmul.f32 %v918_v36, %v903_v15  ;;  %v1676_v36 = vld [vmem:[%s2611_s8] ss:$0 sm:$0xff] }
 0x1c1   : > { %v958_v17 = vmax.f32 %v954_v13, 0.0  ;;  %v953_v43 = vadd.f32 %v936_v10, %v927_v14  ;;  %v1677_v15 = vld [vmem:[%s2613_s10] ss:$0 sm:$0xff] }
 0x1c2   : > { %v960_v21 = vmax.f32 %v956_v16, 0.0  ;;  %v955_v25 = vadd.f32 %v944_v18, %v929_v19 }
 0x1c3   : > { %v962_v23 = vpack.c.bf16 %v958_v17, %v958_v17  ;;  %v957_v20 = vmax.f32 %v953_v43, 0.0 }
 0x1c4   : > { %v964_v26 = vpack.c.bf16 %v960_v21, %v960_v21  ;;  %v959_v27 = vmax.f32 %v955_v25, 0.0 }
 0x1c5   : > { %1260 = vmatprep.mubr.bf16.mxu0 %v962_v23  ;;  %v961_v22 = vpack.c.bf16 %v957_v20, %v957_v20 }
 0x1c6   : > { %1300 = vmatprep.mubr.bf16.mxu1 %v964_v26  ;;  %v963_v28 = vpack.c.bf16 %v959_v27, %v959_v27 }
 0x1c7   : > { %1261 = vmatmul.mubr.bf16.vlgmr.msra.gmra.mxu0 %v961_v22 }
 0x1c8   : > { %1301 = vmatmul.mubr.bf16.vlgmr.msra.gmra.mxu1 %v963_v28  ;;  %1746 = vmatpush3.bf16.msra.mxu0 %v1945_v29 }
 0x1c9   : > { %1747 = vmatprep.subr.bf16.mxu0 %v2217_v30  ;;  %1761 = vmatprep.mubr.msk.bf16.mxu0 %vm2218_vm0, %v2217_v30 }
 0x1cc   : > { %1748 = vmatpush3.bf16.msra.mxu0 %v1946_v24 }
 0x1cd   : > { %1749 = vmatprep.subr.bf16.mxu0 %v2217_v30 }
 0x1d0   : > { %1750 = vmatpush3.bf16.msra.mxu0 %v1947_v31 }
 0x1d1   : > { %1751 = vmatprep.subr.bf16.mxu0 %v2217_v30 }
 0x1d4   : > { %1752 = vmatpush3.bf16.msra.mxu0 %v1948_v32 }
 0x1d5   : > { %1753 = vmatprep.subr.bf16.mxu0 %v2217_v30 }
 0x1d8   : > { %1754 = vmatpush3.bf16.msra.mxu0 %v1949_v35 }
 0x1d9   : > { %1755 = vmatprep.subr.bf16.mxu0 %v2217_v30 }
 0x1dc   : > { %1756 = vmatpush3.bf16.msra.mxu0 %v1950_v37 }
 0x1dd   : > { %1757 = vmatprep.subr.bf16.mxu0 %v2217_v30 }
 0x1e0   : > { %1758 = vmatpush3.bf16.msra.mxu0 %v1951_v38 }
 0x1e1   : > { %1759 = vmatprep.subr.bf16.mxu0 %v2217_v30 }
 0x1e4   : > { %1760 = vmatpush3.bf16.msra.mxu0 %v1952_v39 }
 0x287   : > { %v1708_v40 = vpop.f32.mrf.mxu0 }
 0x288   : > { %v1730_v41 = vpop.f32.mrf.mxu1 }
 0x289   : > { %v1709_v44 = vpop.f32.mrf.mxu0 }
 0x28a   : > { %v1710_v45 = vadd.f32 %v1709_v44, %v1708_v40  ;;  %v1731_v46 = vpop.f32.mrf.mxu1 }
 0x28b   : > { %v1711_v47 = vpop.f32.mrf.mxu0  ;;  %v1732_v49 = vadd.f32 %v1731_v46, %v1730_v41 }
 0x28c   : > { %v1263_v48 = vadd.f32 %v1710_v45, %v1642_v42  ;;  %v1733_v50 = vpop.f32.mrf.mxu1 }
 0x28d   : > { %v1712_v51 = vpop.f32.mrf.mxu0 }
 0x28e   : > { %v1303_v52 = vadd.f32 %v1732_v49, %v1263_v48  ;;  %v1734_v53 = vpop.f32.mrf.mxu1 }
 0x290   : > { %v1308_v54 = vrot.slane %v1303_v52, 4  ;;  %v1315_v55 = vmul.f32 %v1303_v52, %v1303_v52 }
 0x292   : > { %v1309_v56 = vadd.f32 %v1308_v54, %v1303_v52  ;;  %v1316_v57 = vrot.slane %v1315_v55, 4 }
 0x294   : > { %v1310_v58 = vrot.slane %v1309_v56, 2  ;;  %v1317_v59 = vadd.f32 %v1316_v57, %v1315_v55 }
 0x296   : > { %v1311_v60 = vadd.f32 %v1310_v58, %v1309_v56  ;;  %v1318_v61 = vrot.slane %v1317_v59, 2 }
 0x298   : > { %v1312_v62 = vrot.slane %v1311_v60, 1  ;;  %v1319_v63 = vadd.f32 %v1318_v61, %v1317_v59 }
 0x29a   : > { %v1313_v0 = vadd.f32 %v1312_v62, %v1311_v60  ;;  %v1320_v1 = vrot.slane %v1319_v63, 1 }
 0x29c   : > { %v1314_v2 = vmul.f32 0.125, %v1313_v0  ;;  %v1321_v3 = vadd.f32 %v1320_v1, %v1319_v63 }
 0x29e   : > { %v1322_v4 = vmul.f32 0.125, %v1321_v3  ;;  %v1323_v5 = vmul.f32 %v1314_v2, %v1314_v2  ;;  %v1326_v8 = vsub.f32 %v1303_v52, %v1314_v2 }
 0x2a0   : > { %v1324_v6 = vsub.f32 %v1322_v4, %v1323_v5 }
 0x2a2   : > { %v1325_v7 = vmax.f32 %v1324_v6, 0.0 }
 0x2a4   : > { %v1327_v33 = vadd.f32 1e-05, %v1325_v7 }
 0x2a6   : > { %1961 = vrsqrt.f32 %v1327_v33 }
 0x2b3   : > { %v1962_v34 = vpop.eup %1961 }
 0x2b4   : > { %v1329_v10 = vmul.f32 %v1962_v34, %v1326_v8 }
 0x2b6   : > { %v1337_v11 = vmul.f32 %v1675_v9, %v1329_v10 }
 0x2b8   : > { %v1345_v12 = vadd.f32 %v1676_v36, %v1337_v11 }
 0x2ba   : > { %v1346_v13 = vmax.f32 %v1345_v12, 0.0 }
 0x2bc   : > { %v1347_v14 = vpack.c.bf16 %v1346_v13, %v1346_v13 }
 0x2be   : > { %1762 = vmatmul.mubr.bf16.vlgmr.msra.gmra.mxu0 %v1347_v14 }
 0x37e   : > { %v1453_v18 = vpop.f32.mrf.mxu0 }
 0x37f   : > { %v1454_v16 = vadd.f32 %v1677_v15, %v1453_v18 }
 0x380   : > { %v1763_v17 = vpop.f32.mrf.mxu0 }
 0x381   : > { %v1459_v43 = vmax.f32 %v1454_v16, 0.0 }
 0x382   : > { %v1456_v19 = vpop.f32.mrf.mxu0 }
 0x383   : > { %1460 = vmin.xlane.f32.xlu0 %v1459_v43 }
 0x384   : > { %v1764_v21 = vpop.f32.mrf.mxu0 }
 0x387   : > { %1462 = vmax.xlane.f32.xlu0 %v1459_v43 }
 0x40c   : > { %v1461_v23 = vpop.xlane.xlu0 %1460 }
 0x40d   : > { %v1464_v22 = vsub.f32 %v1459_v43, %v1461_v23 }
 0x410   : > { %v1463_v20 = vpop.xlane.xlu0 %1462 }
 0x411   : > { %v1465_v25 = vsub.f32 %v1463_v20, %v1461_v23 }
 0x413   : > { %v1466_v26 = vadd.f32 1e-08, %v1465_v25 }
 0x415   : > { %1963 = vrcp.f32 %v1466_v26 }
 0x422   : > { %v1964_v27 = vpop.eup %1963 }
 0x423   : > { %v1468_v28 = vmul.f32 %v1964_v27, %v1464_v22 }
 0x425   : > { %1469 = vst [vmem:[#allocation14] sm:$0xff] %v1468_v28 }
 0x426 PF: > { %p1818_p5 = scmp.eq.s32.totalorder %s2301_s23, 1  ;;  %s2219_s14 = smov [#allocation14]  }
 0x427   : > { %s1477_s20 = sshll.u32 %s2219_s14, 4  ;;  %s1478_s20 = int_to_ptr.vmem [resolvable:$true] %s1477_s20 }
 0x428   : > { %s2125_s29 = scalar_lea.vmem %s1478_s20, 128  ;;  %p2132_p8 = scmp.lt.s32.totalorder %s1478_s20, %s1478_s20 }
 0x429   : > { %p2126_p9 = scmp.ne.s32.totalorder %s1478_s20, %s2125_s29  ;;  %p2133_p11 = scmp.lt.s32.totalorder %s2125_s29, %s2125_s29 }
 0x42b   : > { %p2127_p2 = pnand %p2126_p9, %p1818_p5  ;;  %p2134_p6 = por %p2133_p11, %p2132_p8 }
 0x42d   : > { %p2128_p10 = pneg %p2127_p2 }
 0x42f   : > { %p2135_p7 = pnand %p2134_p6, %p2128_p10 }
 0x431   : > { %2138 = shalt.err (!%p2135_p7)
}
 0x432   : > { %1786 = dma.vmem_to_hbm [thread:$0]  (%p1818_p5), %s1478_s20, 128, %s2614_s11, [#allocation5]  }
 0x433   : > { %2186 = dma.done.wait (%p1818_p5), [#allocation5], 128  }
 0x434   : > { %2188 = vsyncadd (%p1818_p5), [#allocation5], 4294967168 }
 0x435 PF: > { %p27_p12 = scmp.ge.s32.totalorder %s2361_s28, 4   ;;  %s2638_s17 = smov %s2195_s18 }
 0x436   : > { %s2639_s18 = smov %s2199_s19  ;;  %s2640_s19 = smov %s2373_s21 }
 0x437   : > { %s2641_s20 = smov %s2361_s28  ;;  %29 = sbr.rel (!%p27_p12) target bundleno = 12 (0xc), region = 138 }
 0x43c   :  { %1490 = vsyncpa [#allocation4], 1 }
 0x43d   :  { %1492 = vsyncpa [#allocation4 + $0x1], 1 }
 0x43e   :  { %1493 = vsyncpa [#allocation7], 1 }
 0x43f   :  { %1495 = vsyncpa [#allocation7 + $0x1], 1 }
 0x440   :  { %1496 = vsyncpa [#allocation10], 1 }
 0x441   :  { %1497 = vsyncpa [#allocation13], 1 }
 0x442   :  { %1498 = vsyncpa [#allocation5], 1 }
 0x443   :  { %1500 = vsyncpa [#allocation5 + $0x1], 1 }

</bundles_post_ra>
